<compile_context>
chip_gen: v5e
topology: v5e:2x2
jax: 0.10.0
libtpu: 0.0.40
codegen_flags: <defaults>
</compile_context>

<pallas_src>
import numpy as np
import jax
import jax.numpy as jnp
from jax import lax
from jax.experimental import pallas as pl
from jax.experimental.pallas import tpu as pltpu


def glad_encoder_kernel(x_ref, w_ref, b_ref, ln_ref, beta_ref, out_ref):
    """One batch element per grid step.

    x_ref:    (1, T, D)  input sequence slice for this batch element (VMEM)
    w_ref:    (D, 6D)    [Wq_L^T | Wk_L^T | Wv_L^T | Wq_G^T | Wk_G^T | Wv_G^T]
    b_ref:    (1, 6D)    matching biases
    ln_ref:   (4, D)     [gamma_L ; beta_L ; gamma_G ; beta_G]  (LayerNorm affine)
    beta_ref: (1, 1)     sigmoid(beta_raw[slot])  (SMEM scalar)
    out_ref:  (1, 1, D)  mixed context for this batch element
    """
    T = x_ref.shape[1]
    D = x_ref.shape[2]
    inv_sqrt_dk = 1.0 / float(np.sqrt(D))
    inv_T = 1.0 / float(T)
    eps = 1e-5

    beta = beta_ref[0, 0]
    x = x_ref[0]                                                         # (T, D)

    # Fused q/k/v projection for both branches: one MXU matmul (default precision).
    proj = jnp.dot(x, w_ref[...], preferred_element_type=jnp.float32) + b_ref[...]  # (T, 6D)

    def branch(off, gamma, lbias):
        q = proj[:, off:off + D]                                         # (T, D)
        k = proj[:, off + D:off + 2 * D]                                 # (T, D)
        v = proj[:, off + 2 * D:off + 3 * D]                             # (T, D)
        # scores[i, j] = q_i . k_j  (contract last dims -> q @ k^T, no explicit transpose)
        s = lax.dot_general(q, k, (((1,), (1,)), ((), ())),
                            preferred_element_type=jnp.float32)          # (T, T)
        # PyTorch: softmax over dim=1 of (B, Tq, Tk) -> over the query axis (rows here).
        smax = jnp.max(s, axis=0, keepdims=True)                         # (1, T)
        e = jnp.exp(s - smax)
        denom = jnp.sum(e, axis=0, keepdims=True)                        # (1, T)
        # Fold the post-softmax 1/sqrt(dk) scale into the (1, T) reciprocal vector.
        attn = e * (pl.reciprocal(denom, approx=True) * inv_sqrt_dk)     # (T, T)
        att = jnp.dot(attn, v, preferred_element_type=jnp.float32)       # (T, D)
        # LayerNorm over features (biased variance, eps=1e-5), then mean over time.
        mu = jnp.mean(att, axis=-1, keepdims=True)
        var = jnp.mean(jnp.square(att - mu), axis=-1, keepdims=True)
        ln = (att - mu) * lax.rsqrt(var + eps) * gamma + lbias
        return jnp.sum(ln, axis=0, keepdims=True) * inv_T                # (1, D)

    ctx_l = branch(0, ln_ref[0:1, :], ln_ref[1:2, :])
    ctx_g = branch(3 * D, ln_ref[2:3, :], ln_ref[3:4, :])

    out_ref[0] = ctx_l * beta + ctx_g * (1.0 - beta)                     # (1, D)


def glad_encoder_forward(x, x_len, w_cat, b_cat, ln_cat, beta):
    """Returns (h, c) exactly like the PyTorch module: h == x, c: (B, D)."""
    del x_len  # ignored by SelfAttention_transformer_v1.forward, as in PyTorch
    B, T, D = x.shape
    beta_arr = jnp.asarray(beta, jnp.float32).reshape(1, 1)

    c = pl.pallas_call(
        glad_encoder_kernel,
        out_shape=jax.ShapeDtypeStruct((B, 1, D), jnp.float32),
        grid=(B,),
        in_specs=[
            pl.BlockSpec((1, T, D), lambda b: (b, 0, 0)),          # x slice per batch elem
            pl.BlockSpec((D, 6 * D), lambda b: (0, 0)),            # packed qkv weights (resident)
            pl.BlockSpec((1, 6 * D), lambda b: (0, 0)),            # packed qkv biases  (resident)
            pl.BlockSpec((4, D), lambda b: (0, 0)),                # LayerNorm params   (resident)
            pl.BlockSpec(memory_space=pltpu.MemorySpace.SMEM),     # beta scalar
        ],
        out_specs=pl.BlockSpec((1, 1, D), lambda b: (b, 0, 0)),
        compiler_params=pltpu.CompilerParams(
            dimension_semantics=("parallel",)),                    # shard batch over TCs (v7x)
    )(x, w_cat, b_cat, ln_cat, beta_arr)

    return x, c[:, 0, :]


# ----------------------------- parameter helpers -----------------------------

def init_params(key, din, dhid, n_slots):
    """Synthetic params matching the PyTorch module layout (Linear weight: (out, in))."""
    assert din == 2 * dhid, "PyTorch forward applies both attns to x; needs din == 2*dhid"

    def linear(k, d):
        bound = 1.0 / np.sqrt(d)
        kw, kb = jax.random.split(k)
        W = jax.random.uniform(kw, (d, d), jnp.float32, -bound, bound)
        b = jax.random.uniform(kb, (d,), jnp.float32, -bound, bound)
        return W, b

    def selfattn_params(k, d):
        kq, kk, kv, kg, kb2 = jax.random.split(k, 5)
        Wq, bq = linear(kq, d)
        Wk, bk = linear(kk, d)
        Wv, bv = linear(kv, d)
        ln_g = 1.0 + 0.1 * jax.random.normal(kg, (d,), jnp.float32)
        ln_b = 0.05 * jax.random.normal(kb2, (d,), jnp.float32)
        return dict(Wq=Wq, bq=bq, Wk=Wk, bk=bk, Wv=Wv, bv=bv, ln_g=ln_g, ln_b=ln_b)

    k_loc, k_glob, k_beta = jax.random.split(key, 3)
    return {
        "local": selfattn_params(k_loc, din),
        "global": selfattn_params(k_glob, 2 * dhid),
        "beta_raw": jax.random.uniform(k_beta, (n_slots,), jnp.float32, -0.01, 0.01),
    }


def pack_params(params):
    """Pack both branches' q/k/v weights+biases and LN params into the kernel layout."""
    loc, glo = params["local"], params["global"]
    w_cat = jnp.concatenate(
        [loc["Wq"].T, loc["Wk"].T, loc["Wv"].T,
         glo["Wq"].T, glo["Wk"].T, glo["Wv"].T], axis=1)                     # (D, 6D)
    b_cat = jnp.concatenate(
        [loc["bq"], loc["bk"], loc["bv"],
         glo["bq"], glo["bk"], glo["bv"]])[None, :]                          # (1, 6D)
    ln_cat = jnp.stack(
        [loc["ln_g"], loc["ln_b"], glo["ln_g"], glo["ln_b"]], axis=0)        # (4, D)
    return w_cat, b_cat, ln_cat


# ----------------------------- numpy reference -----------------------------

def _selfattn_ref(x, p):
    B, T, D = x.shape
    Wq, bq = np.asarray(p["Wq"]), np.asarray(p["bq"])
    Wk, bk = np.asarray(p["Wk"]), np.asarray(p["bk"])
    Wv, bv = np.asarray(p["Wv"]), np.asarray(p["bv"])
    q = x @ Wq.T + bq
    k = x @ Wk.T + bk
    v = x @ Wv.T + bv
    s = np.einsum("btd,bsd->bts", q, k)                     # (B, Tq, Tk)
    e = np.exp(s - s.max(axis=1, keepdims=True))
    a = e / e.sum(axis=1, keepdims=True) / np.sqrt(D)       # softmax over query axis, /sqrt(dk)
    att = np.einsum("bts,bsd->btd", a, v)
    mu = att.mean(-1, keepdims=True)
    var = ((att - mu) ** 2).mean(-1, keepdims=True)
    ln = (att - mu) / np.sqrt(var + 1e-5) * np.asarray(p["ln_g"]) + np.asarray(p["ln_b"])
    return ln.sum(axis=1) / T                               # (B, D)


def reference_forward(x, params, slot_idx):
    x = np.asarray(x, np.float32)
    beta = 1.0 / (1.0 + np.exp(-float(np.asarray(params["beta_raw"])[slot_idx])))
    c = _selfattn_ref(x, params["local"]) * beta + _selfattn_ref(x, params["global"]) * (1.0 - beta)
    return x, c


# ----------------------------- test -----------------------------

if __name__ == "__main__":
    B, T, dhid = 2, 8, 16
    din = 2 * dhid                                   # required by the PyTorch forward
    slots = ("restaurant-food", "restaurant-area", "restaurant-pricerange")
    slot = "restaurant-area"

    key = jax.random.PRNGKey(0)
    pkey, xkey = jax.random.split(key, 2)
    params = init_params(pkey, din, dhid, len(slots))

    x = jax.random.normal(xkey, (B, T, din), jnp.float32)
    x_len = jnp.array([T, T - 3], jnp.int32)         # accepted but (correctly) unused

    slot_idx = slots.index(slot)
    beta = jax.nn.sigmoid(params["beta_raw"][slot_idx])
    w_cat, b_cat, ln_cat = pack_params(params)

    h, c = glad_encoder_forward(x, x_len, w_cat, b_cat, ln_cat, beta)
    jax.block_until_ready((h, c))

    h_ref, c_ref = reference_forward(np.asarray(x), params, slot_idx)
    np.testing.assert_array_equal(np.asarray(h), h_ref)      # h = x exactly
    # Tolerance accounts for default (single-pass bf16) MXU precision + approx reciprocal
    # vs the float64/float32 numpy reference; LayerNorm on the small-magnitude attention
    # output amplifies rounding, so a few-percent divergence is expected and acceptable.
    np.testing.assert_allclose(np.asarray(c), c_ref, atol=5e-2, rtol=5e-2)
    print("KERNEL_OK")
</pallas_src>

<mosaic_0001>
module attributes {stable_mosaic.version = 11 : i64} {
  func.func @glad_encoder_kernel(%arg0: i32, %arg1: memref<1x8x32xf32, #tpu.memory_space<vmem>>, %arg2: memref<32x192xf32, #tpu.memory_space<vmem>>, %arg3: memref<1x192xf32, #tpu.memory_space<vmem>>, %arg4: memref<4x32xf32, #tpu.memory_space<vmem>>, %arg5: memref<1x1xf32, #tpu.memory_space<smem>>, %arg6: memref<1x1x32xf32, #tpu.memory_space<vmem>>) attributes {dimension_semantics = [#tpu.dimension_semantics<parallel>], iteration_bounds = array<i64: 2>, scalar_prefetch = 0 : i64, scratch_operands = 0 : i64, tpu.core_type = #tpu.core_type<tc>, window_params = [{transform_indices = @transform_0, window_bounds = array<i64: 1, 8, 32>}, {pipeline_mode = #tpu.pipeline_mode<synchronous>, transform_indices = @transform_1, window_bounds = array<i64: 32, 192>}, {pipeline_mode = #tpu.pipeline_mode<synchronous>, transform_indices = @transform_2, window_bounds = array<i64: 1, 192>}, {pipeline_mode = #tpu.pipeline_mode<synchronous>, transform_indices = @transform_3, window_bounds = array<i64: 4, 32>}, {transform_indices = @transform_4, window_bounds = array<i64: 1, 1>}, {transform_indices = @transform_5, window_bounds = array<i64: 1, 1, 32>}]} {
    %c0 = arith.constant 0 : index
    %c0_0 = arith.constant 0 : index
    %0 = memref.load %arg5[%c0, %c0_0] : memref<1x1xf32, #tpu.memory_space<smem>>
    %c0_1 = arith.constant 0 : index
    %c0_2 = arith.constant 0 : index
    %c0_3 = arith.constant 0 : index
    %1 = vector.load %arg1[%c0_1, %c0_2, %c0_3] : memref<1x8x32xf32, #tpu.memory_space<vmem>>, vector<1x8x32xf32>
    %2 = vector.shape_cast %1 : vector<1x8x32xf32> to vector<8x32xf32>
    %c0_4 = arith.constant 0 : index
    %c0_5 = arith.constant 0 : index
    %3 = vector.load %arg2[%c0_4, %c0_5] : memref<32x192xf32, #tpu.memory_space<vmem>>, vector<32x192xf32>
    %cst = arith.constant dense<0.000000e+00> : vector<8x192xf32>
    %4 = tpu.matmul %2, %3, %cst {dimension_numbers = #tpu.dot_dimension_numbers<[1], [0], [0], [1], [0, 0, 1, 1], [], []>} : vector<8x32xf32>, vector<32x192xf32>, vector<8x192xf32> -> vector<8x192xf32>
    %c0_6 = arith.constant 0 : index
    %c0_7 = arith.constant 0 : index
    %5 = vector.load %arg3[%c0_6, %c0_7] : memref<1x192xf32, #tpu.memory_space<vmem>>, vector<1x192xf32>
    %6 = vector.broadcast %5 : vector<1x192xf32> to vector<8x192xf32>
    %7 = arith.addf %4, %6 : vector<8x192xf32>
    %c0_8 = arith.constant 0 : index
    %c0_9 = arith.constant 0 : index
    %8 = vector.load %arg4[%c0_8, %c0_9] : memref<4x32xf32, #tpu.memory_space<vmem>>, vector<1x32xf32>
    %c1 = arith.constant 1 : index
    %c0_10 = arith.constant 0 : index
    %9 = vector.load %arg4[%c1, %c0_10] : memref<4x32xf32, #tpu.memory_space<vmem>>, vector<1x32xf32>
    %10 = vector.extract_strided_slice %7 {offsets = [0, 0], sizes = [8, 32], strides = [1, 1]} : vector<8x192xf32> to vector<8x32xf32>
    %11 = vector.extract_strided_slice %7 {offsets = [0, 32], sizes = [8, 32], strides = [1, 1]} : vector<8x192xf32> to vector<8x32xf32>
    %12 = vector.extract_strided_slice %7 {offsets = [0, 64], sizes = [8, 32], strides = [1, 1]} : vector<8x192xf32> to vector<8x32xf32>
    %cst_11 = arith.constant dense<0.000000e+00> : vector<8x8xf32>
    %13 = tpu.matmul %10, %11, %cst_11 {dimension_numbers = #tpu.dot_dimension_numbers<[1], [1], [0], [0], [0, 0, 1, 0], [], []>} : vector<8x32xf32>, vector<8x32xf32>, vector<8x8xf32> -> vector<8x8xf32>
    %cst_12 = arith.constant dense<0xFF800000> : vector<8xf32>
    %14 = vector.multi_reduction <maximumf>, %13, %cst_12 [0] : vector<8x8xf32> to vector<8xf32>
    %15 = vector.shape_cast %14 : vector<8xf32> to vector<1x8xf32>
    %16 = vector.broadcast %15 : vector<1x8xf32> to vector<8x8xf32>
    %17 = arith.subf %13, %16 : vector<8x8xf32>
    %18 = math.exp %17 : vector<8x8xf32>
    %cst_13 = arith.constant dense<0.000000e+00> : vector<8xf32>
    %19 = vector.multi_reduction <add>, %18, %cst_13 [0] : vector<8x8xf32> to vector<8xf32>
    %20 = vector.shape_cast %19 : vector<8xf32> to vector<1x8xf32>
    %21 = tpu.reciprocal %20 {approx = true} : vector<1x8xf32> -> vector<1x8xf32>
    %cst_14 = arith.constant 0.176776692 : f32
    %22 = vector.broadcast %cst_14 : f32 to vector<1x8xf32>
    %23 = arith.mulf %21, %22 : vector<1x8xf32>
    %24 = vector.broadcast %23 : vector<1x8xf32> to vector<8x8xf32>
    %25 = arith.mulf %18, %24 : vector<8x8xf32>
    %cst_15 = arith.constant dense<0.000000e+00> : vector<8x32xf32>
    %26 = tpu.matmul %25, %12, %cst_15 {dimension_numbers = #tpu.dot_dimension_numbers<[1], [0], [0], [1], [0, 0, 1, 1], [], []>} : vector<8x8xf32>, vector<8x32xf32>, vector<8x32xf32> -> vector<8x32xf32>
    %cst_16 = arith.constant dense<0.000000e+00> : vector<8xf32>
    %27 = vector.multi_reduction <add>, %26, %cst_16 [1] : vector<8x32xf32> to vector<8xf32>
    %28 = vector.shape_cast %27 : vector<8xf32> to vector<8x1xf32>
    %cst_17 = arith.constant 3.200000e+01 : f32
    %29 = vector.broadcast %cst_17 : f32 to vector<8x1xf32>
    %30 = arith.divf %28, %29 : vector<8x1xf32>
    %31 = vector.broadcast %30 : vector<8x1xf32> to vector<8x32xf32>
    %32 = arith.subf %26, %31 : vector<8x32xf32>
    %33 = arith.mulf %32, %32 : vector<8x32xf32>
    %cst_18 = arith.constant dense<0.000000e+00> : vector<8xf32>
    %34 = vector.multi_reduction <add>, %33, %cst_18 [1] : vector<8x32xf32> to vector<8xf32>
    %35 = vector.shape_cast %34 : vector<8xf32> to vector<8x1xf32>
    %cst_19 = arith.constant 3.200000e+01 : f32
    %36 = vector.broadcast %cst_19 : f32 to vector<8x1xf32>
    %37 = arith.divf %35, %36 : vector<8x1xf32>
    %38 = vector.broadcast %30 : vector<8x1xf32> to vector<8x32xf32>
    %39 = arith.subf %26, %38 : vector<8x32xf32>
    %cst_20 = arith.constant 9.99999974E-6 : f32
    %40 = vector.broadcast %cst_20 : f32 to vector<8x1xf32>
    %41 = arith.addf %37, %40 : vector<8x1xf32>
    %42 = math.rsqrt %41 : vector<8x1xf32>
    %43 = vector.broadcast %42 : vector<8x1xf32> to vector<8x32xf32>
    %44 = arith.mulf %39, %43 : vector<8x32xf32>
    %45 = vector.broadcast %8 : vector<1x32xf32> to vector<8x32xf32>
    %46 = arith.mulf %44, %45 : vector<8x32xf32>
    %47 = vector.broadcast %9 : vector<1x32xf32> to vector<8x32xf32>
    %48 = arith.addf %46, %47 : vector<8x32xf32>
    %cst_21 = arith.constant dense<0.000000e+00> : vector<32xf32>
    %49 = vector.multi_reduction <add>, %48, %cst_21 [0] : vector<8x32xf32> to vector<32xf32>
    %50 = vector.shape_cast %49 : vector<32xf32> to vector<1x32xf32>
    %cst_22 = arith.constant 1.250000e-01 : f32
    %51 = vector.broadcast %cst_22 : f32 to vector<1x32xf32>
    %52 = arith.mulf %50, %51 : vector<1x32xf32>
    %c2 = arith.constant 2 : index
    %c0_23 = arith.constant 0 : index
    %53 = vector.load %arg4[%c2, %c0_23] : memref<4x32xf32, #tpu.memory_space<vmem>>, vector<1x32xf32>
    %c3 = arith.constant 3 : index
    %c0_24 = arith.constant 0 : index
    %54 = vector.load %arg4[%c3, %c0_24] : memref<4x32xf32, #tpu.memory_space<vmem>>, vector<1x32xf32>
    %55 = vector.extract_strided_slice %7 {offsets = [0, 96], sizes = [8, 32], strides = [1, 1]} : vector<8x192xf32> to vector<8x32xf32>
    %56 = vector.extract_strided_slice %7 {offsets = [0, 128], sizes = [8, 32], strides = [1, 1]} : vector<8x192xf32> to vector<8x32xf32>
    %57 = vector.extract_strided_slice %7 {offsets = [0, 160], sizes = [8, 32], strides = [1, 1]} : vector<8x192xf32> to vector<8x32xf32>
    %cst_25 = arith.constant dense<0.000000e+00> : vector<8x8xf32>
    %58 = tpu.matmul %55, %56, %cst_25 {dimension_numbers = #tpu.dot_dimension_numbers<[1], [1], [0], [0], [0, 0, 1, 0], [], []>} : vector<8x32xf32>, vector<8x32xf32>, vector<8x8xf32> -> vector<8x8xf32>
    %cst_26 = arith.constant dense<0xFF800000> : vector<8xf32>
    %59 = vector.multi_reduction <maximumf>, %58, %cst_26 [0] : vector<8x8xf32> to vector<8xf32>
    %60 = vector.shape_cast %59 : vector<8xf32> to vector<1x8xf32>
    %61 = vector.broadcast %60 : vector<1x8xf32> to vector<8x8xf32>
    %62 = arith.subf %58, %61 : vector<8x8xf32>
    %63 = math.exp %62 : vector<8x8xf32>
    %cst_27 = arith.constant dense<0.000000e+00> : vector<8xf32>
    %64 = vector.multi_reduction <add>, %63, %cst_27 [0] : vector<8x8xf32> to vector<8xf32>
    %65 = vector.shape_cast %64 : vector<8xf32> to vector<1x8xf32>
    %66 = tpu.reciprocal %65 {approx = true} : vector<1x8xf32> -> vector<1x8xf32>
    %cst_28 = arith.constant 0.176776692 : f32
    %67 = vector.broadcast %cst_28 : f32 to vector<1x8xf32>
    %68 = arith.mulf %66, %67 : vector<1x8xf32>
    %69 = vector.broadcast %68 : vector<1x8xf32> to vector<8x8xf32>
    %70 = arith.mulf %63, %69 : vector<8x8xf32>
    %cst_29 = arith.constant dense<0.000000e+00> : vector<8x32xf32>
    %71 = tpu.matmul %70, %57, %cst_29 {dimension_numbers = #tpu.dot_dimension_numbers<[1], [0], [0], [1], [0, 0, 1, 1], [], []>} : vector<8x8xf32>, vector<8x32xf32>, vector<8x32xf32> -> vector<8x32xf32>
    %cst_30 = arith.constant dense<0.000000e+00> : vector<8xf32>
    %72 = vector.multi_reduction <add>, %71, %cst_30 [1] : vector<8x32xf32> to vector<8xf32>
    %73 = vector.shape_cast %72 : vector<8xf32> to vector<8x1xf32>
    %cst_31 = arith.constant 3.200000e+01 : f32
    %74 = vector.broadcast %cst_31 : f32 to vector<8x1xf32>
    %75 = arith.divf %73, %74 : vector<8x1xf32>
    %76 = vector.broadcast %75 : vector<8x1xf32> to vector<8x32xf32>
    %77 = arith.subf %71, %76 : vector<8x32xf32>
    %78 = arith.mulf %77, %77 : vector<8x32xf32>
    %cst_32 = arith.constant dense<0.000000e+00> : vector<8xf32>
    %79 = vector.multi_reduction <add>, %78, %cst_32 [1] : vector<8x32xf32> to vector<8xf32>
    %80 = vector.shape_cast %79 : vector<8xf32> to vector<8x1xf32>
    %cst_33 = arith.constant 3.200000e+01 : f32
    %81 = vector.broadcast %cst_33 : f32 to vector<8x1xf32>
    %82 = arith.divf %80, %81 : vector<8x1xf32>
    %83 = vector.broadcast %75 : vector<8x1xf32> to vector<8x32xf32>
    %84 = arith.subf %71, %83 : vector<8x32xf32>
    %cst_34 = arith.constant 9.99999974E-6 : f32
    %85 = vector.broadcast %cst_34 : f32 to vector<8x1xf32>
    %86 = arith.addf %82, %85 : vector<8x1xf32>
    %87 = math.rsqrt %86 : vector<8x1xf32>
    %88 = vector.broadcast %87 : vector<8x1xf32> to vector<8x32xf32>
    %89 = arith.mulf %84, %88 : vector<8x32xf32>
    %90 = vector.broadcast %53 : vector<1x32xf32> to vector<8x32xf32>
    %91 = arith.mulf %89, %90 : vector<8x32xf32>
    %92 = vector.broadcast %54 : vector<1x32xf32> to vector<8x32xf32>
    %93 = arith.addf %91, %92 : vector<8x32xf32>
    %cst_35 = arith.constant dense<0.000000e+00> : vector<32xf32>
    %94 = vector.multi_reduction <add>, %93, %cst_35 [0] : vector<8x32xf32> to vector<32xf32>
    %95 = vector.shape_cast %94 : vector<32xf32> to vector<1x32xf32>
    %cst_36 = arith.constant 1.250000e-01 : f32
    %96 = vector.broadcast %cst_36 : f32 to vector<1x32xf32>
    %97 = arith.mulf %95, %96 : vector<1x32xf32>
    %98 = vector.broadcast %0 : f32 to vector<1x32xf32>
    %99 = arith.mulf %52, %98 : vector<1x32xf32>
    %cst_37 = arith.constant 1.000000e+00 : f32
    %100 = arith.subf %cst_37, %0 : f32
    %101 = vector.broadcast %100 : f32 to vector<1x32xf32>
    %102 = arith.mulf %97, %101 : vector<1x32xf32>
    %103 = arith.addf %99, %102 : vector<1x32xf32>
    %c0_38 = arith.constant 0 : index
    %c0_39 = arith.constant 0 : index
    %c0_40 = arith.constant 0 : index
    %104 = vector.load %arg6[%c0_38, %c0_39, %c0_40] : memref<1x1x32xf32, #tpu.memory_space<vmem>>, vector<1x1x32xf32>
    %105 = vector.shape_cast %104 : vector<1x1x32xf32> to vector<1x32xf32>
    %106 = vector.shape_cast %103 : vector<1x32xf32> to vector<1x1x32xf32>
    tpu.vector_store %arg6[%c0_38, %c0_39, %c0_40], %106 {strides = array<i32>} : memref<1x1x32xf32, #tpu.memory_space<vmem>>, vector<1x1x32xf32>,
    return
  }
  func.func @transform_0(%arg0: i32) -> (i32, i32, i32) {
    %c0_i32 = arith.constant 0 : i32
    %c0_i32_0 = arith.constant 0 : i32
    %c0_i32_1 = arith.constant 0 : i32
    return %arg0, %c0_i32, %c0_i32_0 : i32, i32, i32
  }
  func.func @transform_1(%arg0: i32) -> (i32, i32) {
    %c0_i32 = arith.constant 0 : i32
    %c0_i32_0 = arith.constant 0 : i32
    %c0_i32_1 = arith.constant 0 : i32
    return %c0_i32, %c0_i32_0 : i32, i32
  }
  func.func @transform_2(%arg0: i32) -> (i32, i32) {
    %c0_i32 = arith.constant 0 : i32
    %c0_i32_0 = arith.constant 0 : i32
    %c0_i32_1 = arith.constant 0 : i32
    return %c0_i32, %c0_i32_0 : i32, i32
  }
  func.func @transform_3(%arg0: i32) -> (i32, i32) {
    %c0_i32 = arith.constant 0 : i32
    %c0_i32_0 = arith.constant 0 : i32
    %c0_i32_1 = arith.constant 0 : i32
    return %c0_i32, %c0_i32_0 : i32, i32
  }
  func.func @transform_4(%arg0: i32) -> (i32, i32) {
    %c0_i32 = arith.constant 0 : i32
    %c0_i32_0 = arith.constant 0 : i32
    %c0_i32_1 = arith.constant 0 : i32
    return %c0_i32, %c0_i32_0 : i32, i32
  }
  func.func @transform_5(%arg0: i32) -> (i32, i32, i32) {
    %c0_i32 = arith.constant 0 : i32
    %c0_i32_0 = arith.constant 0 : i32
    %c0_i32_1 = arith.constant 0 : i32
    return %arg0, %c0_i32, %c0_i32_0 : i32, i32, i32
  }
}

</mosaic_0001>

<bundles_post_ra>
// kernel: tpu_custom_call.1
= control target key start
LH: loop header
LB: loop body
LE: loop exit
PB: predicated region body
PF: predicated region fallthrough
CT: control target
= control target key end

     0   :  { %s1156_s0 = inlined_call_operand.hbm [shape: f32[2,8,32], index: 0, kind: input, shape index: {}]   ;;  %s1157_s1 = inlined_call_operand.hbm [shape: f32[32,192], index: 1, kind: input, shape index: {}]   ;;  %s1158_s2 = inlined_call_operand.hbm [shape: f32[1,192], index: 2, kind: input, shape index: {}]   ;;  %s1159_s3 = inlined_call_operand.vmem [shape: f32[4,32], index: 3, kind: input, shape index: {}]   ;;  %s1160_s4 = inlined_call_operand.<no memory space> [shape: f32[1,1], index: 4, kind: input, shape index: {}]   ;;  %s1161_s5 = inlined_call_operand.hbm [shape: f32[2,1,32], index: 5, kind: output, shape index: {}]  }
   0x1   :  { %10 = sst [smem:[#allocation2]] %s1160_s4 }
   0x2   :  { %11 = vsyncpa [#allocation4], 0 }
   0x3   :  { %13 = vsyncpa [#allocation4 + $0x1], 0 }
   0x4   :  { %14 = vsyncpa [#allocation7], 0 }
   0x5   :  { %15 = vsyncpa [#allocation5], 0 }
   0x6   :  { %17 = vsyncpa [#allocation5 + $0x1], 0  ;;  %s980_s20 = smov 0   ;;  %s982_s21 = smov 0  }
   0x7   :  { %s984_s22 = smov 0   ;;  %s986_s23 = smov 0  }
   0x8 LB: > { %s175_s25 = sshll.u32 %s1157_s1, 4  ;;  %s1004_s26 = sadd.s32 4294967295, %s937_s23   ;;  %s937_s23 = sphi %s986_s23, %s1172_s23   ;;  %s933_s22 = sphi %s984_s22, %s1171_s22   ;;  %s929_s21 = sphi %s982_s21, %s1170_s21   ;;  %s925_s20 = sphi %s980_s20, %s1169_s20   ;;  %s176_s25 = int_to_ptr.hbm [resolvable:$true] %s175_s25 }
   0x9   : > { %p666_p0 = scmp.ge.s32.totalorder %s937_s23, 1  ;;  %p44_p1 = scmp.eq.s32.totalorder %s1004_s26, 0 }
   0xa   : > { %p164_p2 = scmp.lt.s32.totalorder %s937_s23, 3  ;;  %s939_s28 = smov [#allocation6]  }
   0xb   : > { %s177_s29 = sshll.u32 %s939_s28, 4  ;;  %s190_s7 = sshll.u32 %s1158_s2, 4  ;;  %s178_s29 = int_to_ptr.vmem [resolvable:$true] %s177_s29  ;;  %s191_s7 = int_to_ptr.hbm [resolvable:$true] %s190_s7 }
   0xc   : > { %p1009_p3 = pnand %p666_p0, %p164_p2  ;;  %s940_s8 = smov [#allocation8]  }
   0xd   : > { %s192_s9 = sshll.u32 %s940_s8, 4  ;;  %s941_s10 = smov 256   ;;  %s193_s9 = int_to_ptr.vmem [resolvable:$true] %s192_s9 }
   0xe   : > { %p698_p4 = pneg %p1009_p3  ;;  %s942_s11 = smov 16  }
   0xf   : > { %s665_s12 = sadd.s32 4294967294, %s937_s23   ;;  %s1023_s13 = sadd.s32 1, %s937_s23  }
  0x10   : > { %p699_p6 = pnand %p698_p4, %p44_p1  ;;  %s27_s14 = ssub.s32 %s937_s23, %s1023_s13 }
  0x11   : > { %s30_s15 = sadd.s32 1, %s933_s22  ;;  %p28_p7 = scmp.eq.s32.totalorder %s27_s14, 0 }
  0x12   : > { %701 = dma.hbm_to_vmem [thread:$0]  (!%p699_p6), %s176_s25, 1024, %s178_s29, [#allocation7], %s941_s10, %s941_s10, %s942_s11  }
  0x13   : > { %704 = dma.hbm_to_vmem [thread:$0]  (!%p699_p6), %s191_s7, 32, %s193_s9, [#allocation7]  }
  0x14   : > { %p37_p8 = scmp.ne.s32.totalorder %s933_s22, %s929_s21  ;;  %p38_p9 = scmp.eq.s32.totalorder %s937_s23, 0 }
  0x15   : > { %p43_p10 = scmp.ne.s32.totalorder %s929_s21, %s925_s20  ;;  %p151_p13 = scmp.eq.s32.totalorder %s1004_s26, 1 }
  0x16   : > { %s1034_s16 = scalar_select %p28_p7, %s933_s22, %s30_s15  }
  0x17   : > { %p1036_p11 = por %p38_p9, %p37_p8  ;;  %p1042_p12 = por %p44_p1, %p43_p10 }
  0x18   : > { %p157_p0 = scmp.eq.s32.totalorder %s665_s12, 1  ;;  %p715_p2 = scmp.lt.s32.totalorder %s937_s23, 2 }
  0x19   : > { %s209_s19 = sand.u32 1, %s933_s22   ;;  %p1049_p4 = por %p151_p13, %p37_p8 }
  0x1a   : > { %p1053_p6 = por %p157_p0, %p43_p10  ;;  %s670_s25 = sshll.u32 %s209_s19, 3 }
  0x1b   : > { %s671_s28 = sshll.u32 %s937_s23, 3  ;;  %s213_s7 = scalar_lea.vmem [#allocation3], %s670_s25 }
  0x1c   : > { %s217_s6 = scalar_lea.hbm %s1156_s0, %s671_s28  ;;  %s221_s8 = sshll.u32 %s213_s7, 4  ;;  %s222_s8 = int_to_ptr.vmem [resolvable:$true] %s221_s8 }
  0x1d   : > { %s219_s9 = sshll.u32 %s217_s6, 4  ;;  %p1063_p7 = pnand %p715_p2, %p1036_p11  ;;  %s220_s9 = int_to_ptr.hbm [resolvable:$true] %s219_s9 }
  0x1e   : > { %s210_s11 = scalar_lea.sflag [#allocation4], %s209_s19  ;;  %s837_s12 = sshra.s32 %s220_s9, 4  ;;  %s838_s12 = int_to_ptr.hbm [resolvable:$true] %s837_s12 }
  0x1f   : > { %s839_s14 = scalar_lea.hbm %s838_s12, 8  ;;  %p841_p9 = pneg %p1063_p7 }
  0x20   : > { %p840_p8 = scmp.ne.s32.totalorder %s838_s12, %s839_s14  ;;  %s844_s28 = scalar_lea.hbm %s1156_s0, 16 }
  0x21   : > { %p845_p11 = scmp.lt.s32.totalorder %s838_s12, %s1156_s0  ;;  %p846_p0 = scmp.lt.s32.totalorder %s844_s28, %s839_s14 }
  0x22   : > { %p842_p10 = pnand %p841_p9, %p840_p8 }
  0x23   : > { %p847_p2 = por %p846_p0, %p845_p11 }
  0x24   : > { %p843_p13 = pneg %p842_p10 }
  0x26   : > { %p848_p5 = pnand %p847_p2, %p843_p13 }
  0x28   : > { %851 = shalt.err (!%p848_p5)
}
  0x29   : > { %708 = dma.hbm_to_vmem [thread:$0]  (!%p1063_p7), %s220_s9, 128, %s222_s8, %s210_s11  }
  0x2a   : > { %230 = sbr.rel (%p1009_p3) target bundleno = 1094 (0x446), region = 40  ;;  %s1080_s19 = sand.u32 (!%p1009_p3), 1, %s929_s21  }
  0x2b   : > { %s673_s30 = sshll.u32 (!%p1009_p3), %s1080_s19, 3  ;;  %s233_s6 = scalar_lea.sflag (!%p1009_p3), [#allocation4], %s1080_s19 }
  0x2c   : > { %s236_s7 = scalar_lea.vmem (!%p1009_p3), [#allocation3], %s673_s30 }
  0x2f   : > { %912 = dma.done.wait (%p1042_p12), %s233_s6, 128  }
  0x30   : > { %914 = vsyncadd (%p1042_p12), %s233_s6, 4294967168 }
  0x31   : > { %916 = dma.done.wait (%p44_p1), [#allocation7], 1056  }
  0x32   : > { %918 = vsyncadd (%p44_p1), [#allocation7], 4294966240  ;;  %v281_v0 = vld [vmem:[#allocation6 + $0x30] sm:$0xff]  ;;  %v279_v1 = vld [vmem:[#allocation6 + $0x20] sm:$0xff]  ;;  %vm289_vm0 = vcmask 261120   ;;  %s943_s27 = smov 32  }
  0x33   : > { %305 = vmatpush.msra.mxu0 %v281_v0  ;;  %v277_v2 = vld [vmem:[#allocation6 + $0x10] sm:$0xff]  ;;  %v275_v3 = vld [vmem:[#allocation6] sm:$0xff]  ;;  %s944_s18 = smov 96   ;;  %s945_s8 = smov 64   ;;  %v282_v9 = vld [vmem:[#allocation6 + $0x38] sm:$0xff]  ;;  %vm362_vm1 = vcmask 64512  }
  0x34   : > { %v274_v4 = vld [vmem:[%s236_s7] sm:$0xff]  ;;  %v283_v5 = vld [vmem:[#allocation8] sm:$0x3]  ;;  %v280_v10 = vld [vmem:[#allocation6 + $0x28] sm:$0xff]  ;;  %325 = vmatpush.msra.mxu1 %v282_v9  ;;  %v946_v0 = vmov 32.0   ;;  %s273_s29 = sld [smem:[#allocation2]]  ;;  %s576_s7 = scalar_lea.hbm %s1161_s5, %s1004_s26 }
  0x35   : > { %306 = vmatpush.msra.mxu0 %v279_v1  ;;  %v285_v6 = vperm.slane %v283_v5, 0  ;;  %v278_v11 = vld [vmem:[#allocation6 + $0x18] sm:$0xff]  ;;  %v276_v12 = vld [vmem:[#allocation6 + $0x8] sm:$0xff]  ;;  %v286_v15 = vperm.slane %v283_v5, 1  ;;  %vm565_vm9 = vcmask 253952   ;;  %s568_s9 = scalar_lea.sflag [#allocation5], %s1080_s19 }
  0x36   : > { %326 = vmatpush.msra.mxu1 %v280_v10  ;;  %s887_s14 = scalar_lea.hbm %s1161_s5, 2 }
  0x37   : > { %307 = vmatpush.msra.mxu0 %v277_v2 }
  0x38   : > { %327 = vmatpush.msra.mxu1 %v278_v11 }
  0x39   : > { %308 = vmatpush.msra.mxu0 %v275_v3 }
  0x3a   : > { %676 = vmatmul.msk.f32.vlgmr.msra.gmra.mxu0 %vm289_vm0, %v274_v4  ;;  %328 = vmatpush.msra.mxu1 %v276_v12  ;;  %s561_s17 = ssub.f32 1.0, %s273_s29 }
  0x3b   : > { %677 = vmatmul.msk.f32.vlgmr.msra.gmra.mxu1 %vm289_vm0, %v274_v4 }
  0xb7   : > { %v310_v7 = vpop.f32.mrf.mxu0 }
  0xb8   : > { %v311_v8 = vadd.f32 %v310_v7, %v285_v6  ;;  %v330_v16 = vpop.f32.mrf.mxu1 }
  0xb9   : > { %v331_v17 = vadd.f32 %v330_v16, %v286_v15 }
  0xba   : > { %452 = vrot.lane.b32.xlu1 %v311_v8, %s943_s27  ;;  %336 = vrot.lane.b32.xlu0 %v311_v8, %s944_s18  ;;  %s272_s27 = scalar_lea.vmem [#allocation9], %s1080_s19 }
  0xc2   : > { %383 = vrot.lane.b32.xlu0 %v311_v8, %s945_s8  ;;  %499 = vrot.lane.b32.xlu1 %v331_v17, %s944_s18  ;;  %s578_s18 = sshll.u32 %s272_s27, 4  ;;  %s580_s8 = sshll.u32 %s576_s7, 4  ;;  %s579_s18 = int_to_ptr.vmem [resolvable:$true] %s578_s18  ;;  %s581_s8 = int_to_ptr.hbm [resolvable:$true] %s580_s8 }
  0xc3   : > { %s881_s10 = sshra.s32 %s581_s8, 4  ;;  %s882_s10 = int_to_ptr.hbm [resolvable:$true] %s881_s10 }
  0xc4   : > { %s883_s11 = scalar_lea.hbm %s882_s10, 1  ;;  %p888_p12 = scmp.lt.s32.totalorder %s882_s10, %s1161_s5 }
  0xc5   : > { %p884_p1 = scmp.ne.s32.totalorder %s882_s10, %s883_s11  ;;  %p889_p7 = scmp.lt.s32.totalorder %s887_s14, %s883_s11 }
  0xc7   : > { %p885_p3 = pnand %p884_p1, %p1049_p4  ;;  %p890_p8 = por %p889_p7, %p888_p12 }
  0xc9   : > { %p886_p5 = pneg %p885_p3 }
  0xcb   : > { %p891_p9 = pnand %p890_p8, %p886_p5 }
 0x12c   : > { %v337_v13 = vpop.permute.xlu0 %336  ;;  %v453_v39 = vpop.permute.xlu1 %452 }
 0x12d   : > { %678 = vmatpush.xpose.msk.msra.mxu2 %vm289_vm0, %v337_v13 }
 0x130   : > { %679 = vmatmul.msk.f32.vlgmr.msra.gmra.mxu2 %vm289_vm0, %v311_v8 }
 0x134   : > { %v384_v14 = vpop.permute.xlu0 %383  ;;  %v500_v40 = vpop.permute.xlu1 %499 }
 0x135   : > { %404 = vmatpush.msra.mxu3 %v384_v14  ;;  %520 = vmatpush.msrb.mxu2 %v500_v40 }
 0x137   : > { %681 = vmatpush.xpose.msk.msrb.mxu3 %vm289_vm0, %v331_v17 }
 0x1b3   : > { %v359_v18 = vpop.f32.mrf.mxu2 }
 0x1b4   : > { %v363_v19 = vsel %vm362_vm1, %v359_v18, -inf }
 0x1b5   : > { %v364_v20 = vrot.slane %v363_v19, 4 }
 0x1b7   : > { %v365_v21 = vmax.f32 %v363_v19, %v364_v20 }
 0x1b9   : > { %v366_v22 = vrot.slane %v365_v21, 2 }
 0x1bb   : > { %v367_v23 = vmax.f32 %v365_v21, %v366_v22 }
 0x1bd   : > { %v368_v24 = vrot.slane %v367_v23, 1 }
 0x1bf   : > { %v369_v25 = vmax.f32 %v367_v23, %v368_v24 }
 0x1c1   : > { %v370_v26 = vsub.f32 %v359_v18, %v369_v25 }
 0x1c3   : > { %v371_v27 = vmul.f32 1.442695, %v370_v26 }
 0x1c5   : > { %763 = vpow2.f32 %v371_v27 }
 0x1cb   : > { %v764_v28 = vpop.eup %763 }
 0x1cc   : > { %v373_v29 = vsel %vm362_vm1, %v764_v28, 0.0 }
 0x1cd   : > { %v374_v30 = vrot.slane %v373_v29, 4 }
 0x1cf   : > { %v375_v31 = vadd.f32 %v374_v30, %v373_v29  ;;  %v759_v30 = vld [vmem:[%s1159_s3] ss:$0 sm:$0xff] }
 0x1d1   : > { %v376_v32 = vrot.slane %v375_v31, 2 }
 0x1d3   : > { %v377_v33 = vadd.f32 %v376_v32, %v375_v31 }
 0x1d5   : > { %v378_v34 = vrot.slane %v377_v33, 1 }
 0x1d7   : > { %v379_v35 = vadd.f32 %v378_v34, %v377_v33  ;;  %v760_v34 = vld [vmem:[%s1159_s3 + $0x1] ss:$0 sm:$0xff] }
 0x1d9   : > { %765 = vrcp.f32 %v379_v35 }
 0x1df   : > { %v766_v36 = vpop.eup %765 }
 0x1e0   : > { %v381_v37 = vmul.f32 0.17677669, %v766_v36 }
 0x1e2   : > { %v382_v38 = vmul.f32 %v764_v28, %v381_v37 }
 0x1e4   : > { %680 = vmatmul.msk.f32.vlgmr.msra.gmra.mxu3 %vm362_vm1, %v382_v38 }
 0x1ec   : > { %682 = vmatmul.msk.f32.vlgmr.msrb.gmra.mxu3 %vm289_vm0, %v453_v39 }
 0x267   : > { %v406_v41 = vpop.f32.mrf.mxu3 }
 0x268   : > { %v409_v42 = vsel %vm289_vm0, %v406_v41, 0.0 }
 0x269   : > { %410 = vadd.xlane.f32.xlu2 %v409_v42 }
 0x26f   : > { %v476_v43 = vpop.f32.mrf.mxu3 }
 0x270   : > { %v479_v44 = vsel %vm362_vm1, %v476_v43, -inf }
 0x271   : > { %v480_v45 = vrot.slane %v479_v44, 4 }
 0x273   : > { %v481_v46 = vmax.f32 %v479_v44, %v480_v45 }
 0x275   : > { %v482_v47 = vrot.slane %v481_v46, 2 }
 0x277   : > { %v483_v48 = vmax.f32 %v481_v46, %v482_v47  ;;  %v761_v46 = vld [vmem:[%s1159_s3 + $0x2] ss:$0 sm:$0xff] }
 0x279   : > { %v484_v49 = vrot.slane %v483_v48, 1 }
 0x27b   : > { %v485_v50 = vmax.f32 %v483_v48, %v484_v49  ;;  %v762_v48 = vld [vmem:[%s1159_s3 + $0x3] ss:$0 sm:$0xff] }
 0x27d   : > { %v486_v51 = vsub.f32 %v476_v43, %v485_v50 }
 0x27f   : > { %v487_v52 = vmul.f32 1.442695, %v486_v51 }
 0x281   : > { %767 = vpow2.f32 %v487_v52 }
 0x287   : > { %v768_v53 = vpop.eup %767 }
 0x288   : > { %v489_v54 = vsel %vm362_vm1, %v768_v53, 0.0 }
 0x289   : > { %v490_v55 = vrot.slane %v489_v54, 4 }
 0x28b   : > { %v491_v56 = vadd.f32 %v490_v55, %v489_v54 }
 0x28d   : > { %v492_v57 = vrot.slane %v491_v56, 2 }
 0x28f   : > { %v493_v58 = vadd.f32 %v492_v57, %v491_v56 }
 0x291   : > { %v494_v59 = vrot.slane %v493_v58, 1 }
 0x293   : > { %v495_v60 = vadd.f32 %v494_v59, %v493_v58 }
 0x295   : > { %769 = vrcp.f32 %v495_v60 }
 0x296   : > { %771 = vrcp.f32 %v946_v0  ;;  %v559_v0 = vstv %s273_s29 }
 0x29b   : > { %v770_v61 = vpop.eup %769 }
 0x29c   : > { %v497_v62 = vmul.f32 0.17677669, %v770_v61  ;;  %v772_v1 = vpop.eup %771 }
 0x29d   : > { %v413_v2 = vmul.f32 32.0, %v772_v1  ;;  %vm417_vm2 = vweird.f32 %v772_v1 }
 0x29e   : > { %v498_v63 = vmul.f32 %v768_v53, %v497_v62 }
 0x29f   : > { %v414_v3 = vsub.f32 1.0, %v413_v2 }
 0x2a0   : > { %683 = vmatmul.msk.f32.vlgmr.msrb.gmra.mxu2 %vm362_vm1, %v498_v63 }
 0x2a1   : > { %v415_v4 = vmul.f32 %v772_v1, %v414_v3 }
 0x2a3   : > { %v416_v5 = vadd.f32 %v772_v1, %v415_v4 }
 0x2a5   : > { %v418_v6 = vsel %vm417_vm2, %v772_v1, %v416_v5  ;;  %v562_v1 = vstv %s561_s17 }
 0x2dc   : > { %v411_v7 = vpop.xlane.xlu2 %410 }
 0x2dd   : > { %v419_v8 = vmul.f32 %v418_v6, %v411_v7 }
 0x2df   : > { %v420_v9 = vsub.f32 %v406_v41, %v419_v8 }
 0x2e1   : > { %v421_v10 = vmul.f32 %v420_v9, %v420_v9 }
 0x2e3   : > { %v422_v11 = vsel %vm289_vm0, %v421_v10, 0.0 }
 0x2e4   : > { %423 = vadd.xlane.f32.xlu0 %v422_v11 }
 0x323   : > { %v522_v12 = vpop.f32.mrf.mxu2 }
 0x324   : > { %v525_v13 = vsel %vm289_vm0, %v522_v12, 0.0 }
 0x325   : > { %526 = vadd.xlane.f32.xlu2 %v525_v13 }
 0x357   : > { %v424_v19 = vpop.xlane.xlu0 %423 }
 0x358   : > { %v425_v20 = vmul.f32 %v424_v19, %v418_v6 }
 0x35a   : > { %v426_v21 = vadd.f32 1e-05, %v425_v20 }
 0x35c   : > { %773 = vrsqrt.f32 %v426_v21  ;;  %vm433_vm4 = vweird.f32 %v426_v21 }
 0x362   : > { %v774_v22 = vpop.eup %773 }
 0x363   : > { %v428_v23 = vmul.f32 %v774_v22, %v426_v21  ;;  %vm434_vm3 = vweird.f32 %v774_v22 }
 0x364   : > { %vm435_vm5 = vmor %vm433_vm4, %vm434_vm3 }
 0x365   : > { %v429_v24 = vmul.f32 %v774_v22, %v428_v23 }
 0x367   : > { %v430_v25 = vmul.f32 0.5, %v429_v24 }
 0x369   : > { %v431_v26 = vsub.f32 1.5, %v430_v25 }
 0x36b   : > { %v432_v27 = vmul.f32 %v774_v22, %v431_v26 }
 0x36d   : > { %v436_v28 = vsel %vm435_vm5, %v774_v22, %v432_v27 }
 0x36e   : > { %v437_v31 = vmul.f32 %v436_v28, %v420_v9 }
 0x370   : > { %v439_v35 = vmul.f32 %v759_v30, %v437_v31 }
 0x372   : > { %v441_v36 = vadd.f32 %v760_v34, %v439_v35 }
 0x374   : > { %v442_v39 = vsel %vm289_vm0, %v441_v36, 0.0 }
 0x375   : > { %v443_v41 = vrot.slane %v442_v39, 4 }
 0x377   : > { %v444_v44 = vadd.f32 %v443_v41, %v442_v39 }
 0x379   : > { %v445_v50 = vrot.slane %v444_v44, 2 }
 0x37b   : > { %v446_v53 = vadd.f32 %v445_v50, %v444_v44 }
 0x37d   : > { %v447_v57 = vrot.slane %v446_v53, 1 }
 0x37f   : > { %v448_v60 = vadd.f32 %v447_v57, %v446_v53 }
 0x381   : > { %v449_v62 = vmul.f32 0.125, %v448_v60 }
 0x383   : > { %v560_v3 = vmul.f32 %v559_v0, %v449_v62 }
 0x398   : > { %v527_v14 = vpop.xlane.xlu2 %526 }
 0x399   : > { %v528_v15 = vmul.f32 %v527_v14, %v418_v6 }
 0x39b   : > { %v529_v16 = vsub.f32 %v522_v12, %v528_v15 }
 0x39d   : > { %v530_v17 = vmul.f32 %v529_v16, %v529_v16 }
 0x39f   : > { %v531_v18 = vsel %vm289_vm0, %v530_v17, 0.0 }
 0x3a0   : > { %532 = vadd.xlane.f32.xlu1 %v531_v18 }
 0x413   : > { %v533_v29 = vpop.xlane.xlu1 %532 }
 0x414   : > { %v534_v32 = vmul.f32 %v533_v29, %v418_v6 }
 0x416   : > { %v535_v33 = vadd.f32 1e-05, %v534_v32 }
 0x418   : > { %775 = vrsqrt.f32 %v535_v33  ;;  %vm542_vm7 = vweird.f32 %v535_v33 }
 0x41e   : > { %v776_v37 = vpop.eup %775 }
 0x41f   : > { %v537_v38 = vmul.f32 %v776_v37, %v535_v33  ;;  %vm543_vm6 = vweird.f32 %v776_v37 }
 0x420   : > { %vm544_vm8 = vmor %vm542_vm7, %vm543_vm6 }
 0x421   : > { %v538_v40 = vmul.f32 %v776_v37, %v537_v38 }
 0x423   : > { %v539_v42 = vmul.f32 0.5, %v538_v40 }
 0x425   : > { %v540_v43 = vsub.f32 1.5, %v539_v42 }
 0x427   : > { %v541_v45 = vmul.f32 %v776_v37, %v540_v43 }
 0x429   : > { %v545_v47 = vsel %vm544_vm8, %v776_v37, %v541_v45 }
 0x42a   : > { %v546_v49 = vmul.f32 %v545_v47, %v529_v16 }
 0x42c   : > { %v548_v51 = vmul.f32 %v761_v46, %v546_v49 }
 0x42e   : > { %v550_v52 = vadd.f32 %v762_v48, %v548_v51 }
 0x430   : > { %v551_v54 = vsel %vm289_vm0, %v550_v52, 0.0 }
 0x431   : > { %v552_v55 = vrot.slane %v551_v54, 4 }
 0x433   : > { %v553_v56 = vadd.f32 %v552_v55, %v551_v54 }
 0x435   : > { %v554_v58 = vrot.slane %v553_v56, 2 }
 0x437   : > { %v555_v59 = vadd.f32 %v554_v58, %v553_v56 }
 0x439   : > { %v556_v61 = vrot.slane %v555_v59, 1 }
 0x43b   : > { %v557_v63 = vadd.f32 %v556_v61, %v555_v59 }
 0x43d   : > { %v558_v2 = vmul.f32 0.125, %v557_v63 }
 0x43f   : > { %v563_v4 = vmul.f32 %v562_v1, %v558_v2 }
 0x441   : > { %v564_v5 = vadd.f32 %v563_v4, %v560_v3 }
 0x443   : > { %566 = vst.msk [vmem:[%s272_s27] sm:$0x1] %vm565_vm9, %v564_v5 }
 0x444   : > { %894 = shalt.err (!%p891_p9)
}
 0x445   : > { %696 = dma.vmem_to_hbm [thread:$0]  (%p1049_p4), %s579_s18, 16, %s581_s8, %s568_s9  }
 0x446 PF: > { %s592_s19 = sand.u32 1, %s925_s20   ;;  %p1168_p10 = scmp.ge.s32.totalorder %s937_s23, 2 }
 0x447   : > { %s593_s28 = scalar_lea.sflag [#allocation5], %s592_s19 }
 0x448   : > { %p710_p13 = pnand %p1168_p10, %p1053_p6 }
 0x44a   : > { %p711_p11 = pneg %p710_p13 }
 0x44c   : > { %920 = dma.done.wait (%p711_p11), %s593_s28, 16  }
 0x44d   : > { %922 = vsyncadd (%p711_p11), %s593_s28, 4294967280  ;;  %p20_p0 = scmp.ge.s32.totalorder %s1023_s13, 4   ;;  %s1169_s20 = smov %s929_s21 }
 0x44e   : > { %s1170_s21 = smov %s933_s22  ;;  %s1171_s22 = smov %s1034_s16 }
 0x44f   : > { %s1172_s23 = smov %s1023_s13  ;;  %22 = sbr.rel (!%p20_p0) target bundleno = 8 (0x8), region = 93 }
 0x454   :  { %598 = vsyncpa [#allocation4], 1 }
 0x455   :  { %600 = vsyncpa [#allocation4 + $0x1], 1 }
 0x456   :  { %601 = vsyncpa [#allocation7], 1 }
 0x457   :  { %602 = vsyncpa [#allocation5], 1 }
 0x458   :  { %604 = vsyncpa [#allocation5 + $0x1], 1 }

</bundles_post_ra>
